<compile_context>
chip_gen: v7x
topology: tpu7x:2x2x1
jax: 0.10.0
libtpu: 0.0.40
codegen_flags: <defaults>
</compile_context>

<pallas_src>
import functools

import jax
import jax.numpy as jnp
from jax import lax
from jax.experimental import pallas as pl
from jax.experimental.pallas import tpu as pltpu


def _triplet_loss_kernel(a_ref, p_ref, n_ref, part_ref, *,
                         margin, eps, total_rows, tm, needs_mask):
    # a_ref / p_ref / n_ref: (tm, D) row tiles; part_ref: (1, 1, 1) f32 partial sum.
    a = a_ref[...].astype(jnp.float32)
    p = p_ref[...].astype(jnp.float32)
    n = n_ref[...].astype(jnp.float32)

    # Row-wise cosine similarity, matching F.cosine_similarity(dim=1, eps=1e-8):
    #   cos(x, y) = x.y / (max(||x||, eps) * max(||y||, eps))
    # rsqrt(max(sumsq, eps^2)) == 1 / max(||x||, eps); reductions stay 2D (tm, 1).
    eps2 = eps * eps
    inv_a = lax.rsqrt(jnp.maximum(jnp.sum(a * a, axis=-1, keepdims=True), eps2))
    inv_p = lax.rsqrt(jnp.maximum(jnp.sum(p * p, axis=-1, keepdims=True), eps2))
    inv_n = lax.rsqrt(jnp.maximum(jnp.sum(n * n, axis=-1, keepdims=True), eps2))

    cos_ap = jnp.sum(a * p, axis=-1, keepdims=True) * (inv_a * inv_p)  # (tm, 1)
    cos_an = jnp.sum(a * n, axis=-1, keepdims=True) * (inv_a * inv_n)  # (tm, 1)

    # d_pos - d_neg + margin = (1 - cos_ap) - (1 - cos_an) + margin
    #                        = cos_an - cos_ap + margin
    losses = jnp.maximum(cos_an - cos_ap + margin, 0.0)                # (tm, 1)

    if needs_mask:
        # Zero out padded rows of the last (partial) tile.  jnp.where is a
        # select, so garbage / NaN in the padded region does not propagate.
        row = pl.program_id(0) * tm + lax.broadcasted_iota(jnp.int32, (tm, 1), 0)
        losses = jnp.where(row < total_rows, losses, 0.0)

    part_ref[...] = jnp.sum(losses).reshape(1, 1, 1)


def _vmem_capacity_bytes():
    try:
        return int(pltpu.get_tpu_info().vmem_capacity_bytes)
    except Exception:
        return 64 * 1024 * 1024  # conservative (v7x-sized) fallback


def _sublane_align(dtype):
    itemsize = jnp.dtype(dtype).itemsize
    # f32 -> 8, bf16 -> 16, int8/fp8 -> 32 sublane packing.
    return max(8, 32 // max(1, itemsize))


def _pick_row_tile(B, D, dtype, vmem_budget_bytes):
    itemsize = jnp.dtype(dtype).itemsize
    align = _sublane_align(dtype)
    # 3 inputs x 2 double-buffered pipeline tiles (input dtype) plus roughly
    # 6 tile-sized f32 live temporaries inside the kernel (casts + products).
    per_row_bytes = 3 * 2 * D * itemsize + 6 * D * 4
    max_rows = max(align, vmem_budget_bytes // per_row_bytes)
    b_pad = -(-B // align) * align
    tm = min(int(max_rows), 8192, b_pad)
    tm = max(align, (tm // align) * align)
    return tm


def triplet_loss(rep_anchor, rep_pos, rep_neg, *, triplet_margin=1.0, eps=1e-8,
                 vmem_budget_bytes=None):
    B, D = rep_anchor.shape
    assert rep_pos.shape == (B, D) and rep_neg.shape == (B, D)

    vmem_cap = _vmem_capacity_bytes()
    if vmem_budget_bytes is None:
        vmem_budget_bytes = vmem_cap // 2        # ~32 MiB on v7x, ~64 MiB on v5e/v6e
    vmem_limit = max(32 * 1024 * 1024,
                     min(vmem_cap - 8 * 1024 * 1024,
                         vmem_budget_bytes + 24 * 1024 * 1024))

    dtype = rep_anchor.dtype
    itemsize = jnp.dtype(dtype).itemsize
    tm = _pick_row_tile(B, D, dtype, vmem_budget_bytes)
    grid = (pl.cdiv(B, tm),)
    needs_mask = (B % tm) != 0

    kernel = functools.partial(
        _triplet_loss_kernel,
        margin=float(triplet_margin),
        eps=float(eps),
        total_rows=B,
        tm=tm,
        needs_mask=needs_mask,
    )

    row_spec = pl.BlockSpec((tm, D), lambda i: (i, 0))
    cost = pl.CostEstimate(
        flops=10 * B * D,            # 5 length-D dot products per row
        transcendentals=3 * B,       # 3 rsqrts per row
        bytes_accessed=3 * B * D * itemsize + grid[0] * 4,
    )

    partials = pl.pallas_call(
        kernel,
        out_shape=jax.ShapeDtypeStruct((grid[0], 1, 1), jnp.float32),
        grid=grid,
        in_specs=[row_spec, row_spec, row_spec],
        out_specs=pl.BlockSpec((1, 1, 1), lambda i: (i, 0, 0)),
        compiler_params=pltpu.CompilerParams(
            # Each grid step writes its own partial-sum block -> fully parallel
            # (lets v7x shard the batch sweep across both TensorCores).
            dimension_semantics=("parallel",),
            vmem_limit_bytes=int(vmem_limit),
        ),
        cost_estimate=cost,
    )(rep_anchor, rep_pos, rep_neg)

    return jnp.sum(partials) / jnp.float32(B)    # mean reduction


def _triplet_loss_ref(a, p, n, margin=1.0, eps=1e-8):
    a = a.astype(jnp.float32)
    p = p.astype(jnp.float32)
    n = n.astype(jnp.float32)

    def cos(x, y):
        nx = jnp.maximum(jnp.linalg.norm(x, axis=-1), eps)
        ny = jnp.maximum(jnp.linalg.norm(y, axis=-1), eps)
        return jnp.sum(x * y, axis=-1) / (nx * ny)

    d_pos = 1.0 - cos(a, p)
    d_neg = 1.0 - cos(a, n)
    return jnp.mean(jnp.maximum(d_pos - d_neg + margin, 0.0))


if __name__ == "__main__":
    key = jax.random.PRNGKey(0)

    # Test 1: small shape consistent with the module (batch=8, hidden=32).
    ka, kp, kn = jax.random.split(key, 3)
    B, D = 8, 32
    rep_anchor = jax.random.normal(ka, (B, D), dtype=jnp.float32)
    rep_pos = jax.random.normal(kp, (B, D), dtype=jnp.float32)
    rep_neg = jax.random.normal(kn, (B, D), dtype=jnp.float32)

    loss = triplet_loss(rep_anchor, rep_pos, rep_neg, triplet_margin=1.0)
    jax.block_until_ready(loss)
    ref = _triplet_loss_ref(rep_anchor, rep_pos, rep_neg, margin=1.0)
    assert jnp.allclose(loss, ref, atol=1e-4, rtol=1e-4), (loss, ref)

    # Test 2: non-divisible batch with a tiny forced VMEM budget to exercise the
    # cdiv grid, the masked final tile, and the multi-step parallel partials.
    kb = jax.random.split(key, 6)
    B2, D2 = 100, 128
    a2 = jax.random.normal(kb[3], (B2, D2), dtype=jnp.float32)
    p2 = jax.random.normal(kb[4], (B2, D2), dtype=jnp.float32)
    n2 = jax.random.normal(kb[5], (B2, D2), dtype=jnp.float32)

    loss2 = triplet_loss(a2, p2, n2, triplet_margin=0.5,
                         vmem_budget_bytes=64 * 1024)
    jax.block_until_ready(loss2)
    ref2 = _triplet_loss_ref(a2, p2, n2, margin=0.5)
    assert jnp.allclose(loss2, ref2, atol=1e-4, rtol=1e-4), (loss2, ref2)

    print("KERNEL_OK")
</pallas_src>

<mosaic_0001>
module attributes {stable_mosaic.version = 11 : i64} {
  func.func @_triplet_loss_kernel(%arg0: i32, %arg1: memref<8x32xf32, #tpu.memory_space<vmem>>, %arg2: memref<8x32xf32, #tpu.memory_space<vmem>>, %arg3: memref<8x32xf32, #tpu.memory_space<vmem>>, %arg4: memref<1x1x1xf32, #tpu.memory_space<vmem>>) attributes {dimension_semantics = [#tpu.dimension_semantics<parallel>], iteration_bounds = array<i64: 1>, scalar_prefetch = 0 : i64, scratch_operands = 0 : i64, tpu.core_type = #tpu.core_type<tc>, window_params = [{transform_indices = @transform_0, window_bounds = array<i64: 8, 32>}, {transform_indices = @transform_1, window_bounds = array<i64: 8, 32>}, {transform_indices = @transform_2, window_bounds = array<i64: 8, 32>}, {transform_indices = @transform_3, window_bounds = array<i64: 1, 1, 1>}]} {
    %c0 = arith.constant 0 : index
    %c0_0 = arith.constant 0 : index
    %0 = vector.load %arg1[%c0, %c0_0] : memref<8x32xf32, #tpu.memory_space<vmem>>, vector<8x32xf32>
    %c0_1 = arith.constant 0 : index
    %c0_2 = arith.constant 0 : index
    %1 = vector.load %arg2[%c0_1, %c0_2] : memref<8x32xf32, #tpu.memory_space<vmem>>, vector<8x32xf32>
    %c0_3 = arith.constant 0 : index
    %c0_4 = arith.constant 0 : index
    %2 = vector.load %arg3[%c0_3, %c0_4] : memref<8x32xf32, #tpu.memory_space<vmem>>, vector<8x32xf32>
    %3 = arith.mulf %0, %0 : vector<8x32xf32>
    %cst = arith.constant dense<0.000000e+00> : vector<8xf32>
    %4 = vector.multi_reduction <add>, %3, %cst [1] : vector<8x32xf32> to vector<8xf32>
    %5 = vector.shape_cast %4 : vector<8xf32> to vector<8x1xf32>
    %cst_5 = arith.constant 1.000000e-16 : f32
    %6 = vector.broadcast %cst_5 : f32 to vector<8x1xf32>
    %7 = arith.maximumf %5, %6 : vector<8x1xf32>
    %8 = math.rsqrt %7 : vector<8x1xf32>
    %9 = arith.mulf %1, %1 : vector<8x32xf32>
    %cst_6 = arith.constant dense<0.000000e+00> : vector<8xf32>
    %10 = vector.multi_reduction <add>, %9, %cst_6 [1] : vector<8x32xf32> to vector<8xf32>
    %11 = vector.shape_cast %10 : vector<8xf32> to vector<8x1xf32>
    %cst_7 = arith.constant 1.000000e-16 : f32
    %12 = vector.broadcast %cst_7 : f32 to vector<8x1xf32>
    %13 = arith.maximumf %11, %12 : vector<8x1xf32>
    %14 = math.rsqrt %13 : vector<8x1xf32>
    %15 = arith.mulf %2, %2 : vector<8x32xf32>
    %cst_8 = arith.constant dense<0.000000e+00> : vector<8xf32>
    %16 = vector.multi_reduction <add>, %15, %cst_8 [1] : vector<8x32xf32> to vector<8xf32>
    %17 = vector.shape_cast %16 : vector<8xf32> to vector<8x1xf32>
    %cst_9 = arith.constant 1.000000e-16 : f32
    %18 = vector.broadcast %cst_9 : f32 to vector<8x1xf32>
    %19 = arith.maximumf %17, %18 : vector<8x1xf32>
    %20 = math.rsqrt %19 : vector<8x1xf32>
    %21 = arith.mulf %0, %1 : vector<8x32xf32>
    %cst_10 = arith.constant dense<0.000000e+00> : vector<8xf32>
    %22 = vector.multi_reduction <add>, %21, %cst_10 [1] : vector<8x32xf32> to vector<8xf32>
    %23 = vector.shape_cast %22 : vector<8xf32> to vector<8x1xf32>
    %24 = arith.mulf %8, %14 : vector<8x1xf32>
    %25 = arith.mulf %23, %24 : vector<8x1xf32>
    %26 = arith.mulf %0, %2 : vector<8x32xf32>
    %cst_11 = arith.constant dense<0.000000e+00> : vector<8xf32>
    %27 = vector.multi_reduction <add>, %26, %cst_11 [1] : vector<8x32xf32> to vector<8xf32>
    %28 = vector.shape_cast %27 : vector<8xf32> to vector<8x1xf32>
    %29 = arith.mulf %8, %20 : vector<8x1xf32>
    %30 = arith.mulf %28, %29 : vector<8x1xf32>
    %31 = arith.subf %30, %25 : vector<8x1xf32>
    %cst_12 = arith.constant 1.000000e+00 : f32
    %32 = vector.broadcast %cst_12 : f32 to vector<8x1xf32>
    %33 = arith.addf %31, %32 : vector<8x1xf32>
    %cst_13 = arith.constant 0.000000e+00 : f32
    %34 = vector.broadcast %cst_13 : f32 to vector<8x1xf32>
    %35 = arith.maximumf %33, %34 : vector<8x1xf32>
    %36 = vector.shape_cast %35 : vector<8x1xf32> to vector<1x8x1xf32>
    %cst_14 = arith.constant dense<0.000000e+00> : vector<1xf32>
    %37 = vector.multi_reduction <add>, %36, %cst_14 [1, 2] : vector<1x8x1xf32> to vector<1xf32>
    %38 = vector.shape_cast %37 : vector<1xf32> to vector<1x1x1xf32>
    %39 = vector.extract %38[0, 0, 0] : f32 from vector<1x1x1xf32>
    %40 = vector.broadcast %39 : f32 to vector<1x1x1xf32>
    %c0_15 = arith.constant 0 : index
    %c0_16 = arith.constant 0 : index
    %c0_17 = arith.constant 0 : index
    %41 = vector.load %arg4[%c0_15, %c0_16, %c0_17] : memref<1x1x1xf32, #tpu.memory_space<vmem>>, vector<1x1x1xf32>
    tpu.vector_store %arg4[%c0_15, %c0_16, %c0_17], %40 {strides = array<i32>} : memref<1x1x1xf32, #tpu.memory_space<vmem>>, vector<1x1x1xf32>,
    return
  }
  func.func @transform_0(%arg0: i32) -> (i32, i32) {
    %c0_i32 = arith.constant 0 : i32
    %c0_i32_0 = arith.constant 0 : i32
    return %arg0, %c0_i32 : i32, i32
  }
  func.func @transform_1(%arg0: i32) -> (i32, i32) {
    %c0_i32 = arith.constant 0 : i32
    %c0_i32_0 = arith.constant 0 : i32
    return %arg0, %c0_i32 : i32, i32
  }
  func.func @transform_2(%arg0: i32) -> (i32, i32) {
    %c0_i32 = arith.constant 0 : i32
    %c0_i32_0 = arith.constant 0 : i32
    return %arg0, %c0_i32 : i32, i32
  }
  func.func @transform_3(%arg0: i32) -> (i32, i32, i32) {
    %c0_i32 = arith.constant 0 : i32
    %c0_i32_0 = arith.constant 0 : i32
    %c0_i32_1 = arith.constant 0 : i32
    return %arg0, %c0_i32, %c0_i32_0 : i32, i32, i32
  }
}

</mosaic_0001>

<bundles_post_ra>
// kernel: tpu_custom_call.1
= control target key start
LH: loop header
LB: loop body
LE: loop exit
PB: predicated region body
PF: predicated region fallthrough
CT: control target
= control target key end

     0   :  { %8 = vsyncpa [#allocation3], 0  ;;  %s300_s0 = inlined_call_operand.hbm [shape: f32[8,32], index: 0, kind: input, shape index: {}]   ;;  %s301_s1 = inlined_call_operand.hbm [shape: f32[8,32], index: 1, kind: input, shape index: {}]   ;;  %s302_s2 = inlined_call_operand.hbm [shape: f32[8,32], index: 2, kind: input, shape index: {}]   ;;  %s303_s3 = inlined_call_operand.hbm [shape: f32[1,1,1], index: 3, kind: output, shape index: {}]  }
   0x1   :  { %9 = vsyncpa [#allocation6], 0 }
   0x2   :  { %10 = vsyncpa [#allocation4], 0  ;;  %s223_s12 = smov [#allocation5]   ;;  %s224_s14 = smov [#allocation2]  }
   0x3   :  { %s27_s13 = sshll.u32 %s223_s12, 4  ;;  %s17_s15 = sshll.u32 %s224_s14, 4  ;;  %s28_s13 = int_to_ptr.vmem [resolvable:$true] %s27_s13  ;;  %s18_s15 = int_to_ptr.vmem [resolvable:$true] %s17_s15 }
   0x4   :  { %s129_s18 = scalar_lea.hbm %s301_s1, 128 }
   0x5   :  { %p130_p0 = scmp.ne.s32.totalorder %s301_s1, %s129_s18  ;;  %p133_p1 = scmp.lt.u32.totalorder %s129_s18, %s301_s1 }
   0x7   :  { %p135_p2 = pnand %p133_p1, %p130_p0 }
   0x9   :  { %138 = shalt.err (!%p135_p2)
}
   0xa   :  { %s139_s23 = scalar_lea.vmem %s28_s13, 128  ;;  %p144_p4 = scmp.lt.s32.totalorder %s28_s13, %s28_s13 }
   0xb   :  { %p140_p3 = scmp.ne.s32.totalorder %s28_s13, %s139_s23  ;;  %p145_p5 = scmp.lt.s32.totalorder %s139_s23, %s139_s23 }
   0xd   :  { %p146_p6 = por %p145_p5, %p144_p4 }
   0xf   :  { %p147_p7 = pnand %p146_p6, %p140_p3 }
  0x11   :  { %150 = shalt.err (!%p147_p7)
}
  0x12   :  { %30 = dma.hbm_to_vmem [thread:$0]  %s301_s1, 128, %s28_s13, [#allocation6]  }
  0x13   :  { %s151_s28 = scalar_lea.hbm %s300_s0, 128 }
  0x14   :  { %p152_p8 = scmp.ne.s32.totalorder %s300_s0, %s151_s28  ;;  %p155_p9 = scmp.lt.u32.totalorder %s151_s28, %s300_s0 }
  0x16   :  { %p157_p10 = pnand %p155_p9, %p152_p8 }
  0x18   :  { %160 = shalt.err (!%p157_p10)
}
  0x19   :  { %s161_s6 = scalar_lea.vmem %s18_s15, 128  ;;  %p166_p12 = scmp.lt.s32.totalorder %s18_s15, %s18_s15 }
  0x1a   :  { %p162_p11 = scmp.ne.s32.totalorder %s18_s15, %s161_s6  ;;  %p167_p13 = scmp.lt.s32.totalorder %s161_s6, %s161_s6 }
  0x1c   :  { %p168_p0 = por %p167_p13, %p166_p12 }
  0x1e   :  { %p169_p1 = pnand %p168_p0, %p162_p11 }
  0x20   :  { %172 = shalt.err (!%p169_p1)
}
  0x21   :  { %20 = dma.hbm_to_vmem [thread:$0]  %s300_s0, 128, %s18_s15, [#allocation3]  }
  0x22   :  { %s225_s8 = smov [#allocation7]   ;;  %s173_s12 = scalar_lea.hbm %s302_s2, 128 }
  0x23   :  { %s37_s9 = sshll.u32 %s225_s8, 4  ;;  %p174_p2 = scmp.ne.s32.totalorder %s302_s2, %s173_s12  ;;  %s38_s9 = int_to_ptr.vmem [resolvable:$true] %s37_s9 }
  0x24   :  { %p177_p3 = scmp.lt.u32.totalorder %s173_s12, %s302_s2 }
  0x26   :  { %p179_p4 = pnand %p177_p3, %p174_p2 }
  0x28   :  { %182 = shalt.err (!%p179_p4)
}
  0x29   :  { %s183_s18 = scalar_lea.vmem %s38_s9, 128  ;;  %p188_p6 = scmp.lt.s32.totalorder %s38_s9, %s38_s9 }
  0x2a   :  { %p184_p5 = scmp.ne.s32.totalorder %s38_s9, %s183_s18  ;;  %p189_p7 = scmp.lt.s32.totalorder %s183_s18, %s183_s18 }
  0x2c   :  { %p190_p8 = por %p189_p7, %p188_p6 }
  0x2e   :  { %p191_p9 = pnand %p190_p8, %p184_p5 }
  0x30   :  { %194 = shalt.err (!%p191_p9)
}
  0x31   :  { %40 = dma.hbm_to_vmem [thread:$0]  %s302_s2, 128, %s38_s9, [#allocation6]  }
  0x32   :  { %217 = dma.done.wait [#allocation3], 128  }
  0x33   :  { %218 = vsyncadd [#allocation3], 4294967168 }
  0x34   :  { %219 = dma.done.wait [#allocation6], 256  }
  0x35   :  { %220 = vsyncadd [#allocation6], 4294967040  ;;  %v52_v0 = vld [vmem:[#allocation7] sm:$0xff]  ;;  %vm54_vm0 = vcmask 261120   ;;  %v50_v1 = vld [vmem:[#allocation2] sm:$0xff]  ;;  %vm87_vm1 = vcmask 7168  }
  0x36   :  { %v51_v2 = vld [vmem:[#allocation5] sm:$0xff]  ;;  %v66_v3 = vmul.f32 %v52_v0, %v52_v0  ;;  %v53_v4 = vmul.f32 %v50_v1, %v50_v1  ;;  %v78_v10 = vmul.f32 %v52_v0, %v50_v1  ;;  %s226_s2 = smov [#allocation8]   ;;  %vm99_vm2 = vcmask 0  }
  0x37   :  { %v60_v5 = vmul.f32 %v51_v2, %v51_v2  ;;  %v72_v6 = vmul.f32 %v51_v2, %v50_v1  ;;  %s107_s19 = sshll.u32 %s226_s2, 4  ;;  %s108_s19 = int_to_ptr.vmem [resolvable:$true] %s107_s19 }
  0x38   :  { %v67_v7 = vsel %vm54_vm0, %v66_v3, 0.0  ;;  %v55_v8 = vsel %vm54_vm0, %v53_v4, 0.0  ;;  %v79_v12 = vsel %vm54_vm0, %v78_v10, 0.0  ;;  %s195_s21 = scalar_lea.vmem %s108_s19, 16  ;;  %s199_s22 = scalar_lea.vmem %s108_s19, 32 }
  0x39   :  { %68 = vadd.xlane.f32.xlu1 %v67_v7  ;;  %56 = vadd.xlane.f32.xlu0 %v55_v8  ;;  %v61_v9 = vsel %vm54_vm0, %v60_v5, 0.0  ;;  %v73_v11 = vsel %vm54_vm0, %v72_v6, 0.0  ;;  %p196_p10 = scmp.ne.s32.totalorder %s108_s19, %s195_s21  ;;  %p200_p11 = scmp.lt.s32.totalorder %s108_s19, %s108_s19 }
  0x3a   :  { %p201_p12 = scmp.lt.s32.totalorder %s199_s22, %s195_s21 }
  0x3c   :  { %p202_p13 = por %p201_p12, %p200_p11 }
  0x3d   :  { %62 = vadd.xlane.f32.xlu0 %v61_v9  ;;  %74 = vadd.xlane.f32.xlu1 %v73_v11 }
  0x3e   :  { %p203_p0 = pnand %p202_p13, %p196_p10 }
  0x41   :  { %80 = vadd.xlane.f32.xlu0 %v79_v12 }
  0xc6   :  { %v69_v13 = vpop.xlane.xlu1 %68  ;;  %v57_v14 = vpop.xlane.xlu0 %56 }
  0xc7   :  { %v70_v15 = vmax.f32 %v69_v13, 1e-16  ;;  %v58_v16 = vmax.f32 %v57_v14, 1e-16 }
  0xc9   :  { %123 = vrsqrt.f32 %v70_v15 }
  0xca   :  { %125 = vrsqrt.f32 %v58_v16  ;;  %v63_v17 = vpop.xlane.xlu0 %62  ;;  %v75_v24 = vpop.xlane.xlu1 %74 }
  0xcb   :  { %v64_v18 = vmax.f32 %v63_v17, 1e-16 }
  0xcd   :  { %127 = vrsqrt.f32 %v64_v18 }
  0xce   :  { %v81_v23 = vpop.xlane.xlu0 %80 }
  0xd3   :  { %v124_v19 = vpop.eup %123 }
  0xd4   :  { %v126_v20 = vpop.eup %125 }
  0xd5   :  { %v82_v21 = vmul.f32 %v126_v20, %v124_v19 }
  0xd7   :  { %v128_v22 = vpop.eup %127  ;;  %v83_v26 = vmul.f32 %v82_v21, %v81_v23 }
  0xd8   :  { %v76_v25 = vmul.f32 %v128_v22, %v126_v20 }
  0xda   :  { %v77_v27 = vmul.f32 %v76_v25, %v75_v24 }
  0xdc   :  { %v84_v28 = vsub.f32 %v83_v26, %v77_v27 }
  0xde   :  { %v85_v29 = vadd.f32 1.0, %v84_v28 }
  0xe0   :  { %v86_v30 = vmax.f32 %v85_v29, 0.0 }
  0xe2   :  { %v88_v31 = vsel %vm87_vm1, %v86_v30, 0.0 }
  0xe3   :  { %89 = vadd.xlane.f32.xlu1 %v88_v31 }
 0x170   :  { %v90_v32 = vpop.xlane.xlu1 %89 }
 0x171   :  { %v91_v33 = vrot.slane %v90_v32, 4 }
 0x173   :  { %v92_v34 = vadd.f32 %v91_v33, %v90_v32 }
 0x175   :  { %v93_v35 = vrot.slane %v92_v34, 2 }
 0x177   :  { %v94_v36 = vadd.f32 %v93_v35, %v92_v34 }
 0x179   :  { %v95_v37 = vrot.slane %v94_v36, 1 }
 0x17b   :  { %v96_v38 = vadd.f32 %v95_v37, %v94_v36 }
 0x17d   :  { %117 = vpush %v96_v38 }
 0x1ae   :  { %s118_s20 = spop %117 }
 0x1af   :  { %v98_v39 = vstv %s118_s20 }
 0x1b0   :  { %100 = vst.msk [vmem:[#allocation8] sm:$0x1] %vm99_vm2, %v98_v39 }
 0x1b1   :  { %206 = shalt.err (!%p203_p0)
}
 0x1b2   :  { %s207_s25 = scalar_lea.hbm %s303_s3, 16 }
 0x1b3   :  { %p208_p1 = scmp.ne.s32.totalorder %s303_s3, %s207_s25  ;;  %p211_p2 = scmp.lt.u32.totalorder %s207_s25, %s303_s3 }
 0x1b5   :  { %p213_p3 = pnand %p211_p2, %p208_p1 }
 0x1b7   :  { %216 = shalt.err (!%p213_p3)
}
 0x1b8   :  { %110 = dma.vmem_to_hbm [thread:$0]  %s108_s19, 16, %s303_s3, [#allocation4]  }
 0x1b9   :  { %221 = dma.done.wait [#allocation4], 16  }
 0x1ba   :  { %222 = vsyncadd [#allocation4], 4294967280 }
 0x1bb   :  { %114 = vsyncpa [#allocation3], 1 }
 0x1bc   :  { %115 = vsyncpa [#allocation6], 1 }
 0x1bd   :  { %116 = vsyncpa [#allocation4], 1 }

</bundles_post_ra>
